<compile_context>
chip_gen: v7x
topology: tpu7x:2x2x1
jax: 0.10.0
libtpu: 0.0.40
codegen_flags: <defaults>
</compile_context>

<pallas_src>
import functools

import jax
import jax.numpy as jnp
from jax.experimental import pallas as pl
from jax.experimental.pallas import tpu as pltpu

NEG_FILL = -1e30          # finite "minus infinity" for class-dim masking (no inf arithmetic)
MAX_TILE_C = 4096         # cap on vocab columns per class tile


def _round_up(a, b):
    return (a + b - 1) // b * b


def _ce_kernel(x_ref, lab_ref, y_ref, psum_ref, pcnt_ref, m_sc, s_sc, *, num_classes):
    """Masked cross-entropy (ignore_index = -1) with online logsumexp over class tiles.

    Grid: (row_tiles [parallel], class_tiles [arbitrary, innermost]).

    x_ref   : (tile_n, tile_c) logits block (original dtype, cast to f32 in-kernel)
    lab_ref : (tile_n, 1) f32 pre-gathered label logit (0 for ignored/padded rows);
              resident across class tiles
    y_ref   : (tile_n, 1) int32 labels (-1 => ignored row); resident across class tiles
    psum_ref: (1, 1, 1) f32 per-row-tile sum of per-row losses
    pcnt_ref: (1, 1, 1) f32 per-row-tile count of valid rows
    m_sc, s_sc : (tile_n, 1) f32 scratch (running max / running sum-exp), resident
                 across the class axis.
    """
    k = pl.program_id(1)
    nk = pl.num_programs(1)
    tile_c = x_ref.shape[-1]

    @pl.when(k == 0)
    def _():
        m_sc[...] = jnp.full_like(m_sc, NEG_FILL)
        s_sc[...] = jnp.zeros_like(s_sc)

    def online_update(x):
        # Streaming logsumexp over the class (lane) axis.
        m_prev = m_sc[...]
        m_new = jnp.maximum(m_prev, jnp.max(x, axis=-1, keepdims=True))
        s_sc[...] = (s_sc[...] * jnp.exp(m_prev - m_new)
                     + jnp.sum(jnp.exp(x - m_new), axis=-1, keepdims=True))
        m_sc[...] = m_new

    rem = num_classes % tile_c
    if rem == 0:
        # No padded vocab columns anywhere: zero masking work on every tile.
        online_update(x_ref[...].astype(jnp.float32))
    else:
        # Mask only the last class tile's overshoot lanes; all other tiles run clean.
        @pl.when(k < nk - 1)
        def _():
            online_update(x_ref[...].astype(jnp.float32))

        @pl.when(k == nk - 1)
        def _():
            x = x_ref[...].astype(jnp.float32)
            col = jax.lax.broadcasted_iota(jnp.int32, x.shape, 1)
            online_update(jnp.where(col < rem, x, NEG_FILL))

    @pl.when(k == nk - 1)
    def _():
        # Select (not multiply) so NaN/Inf garbage in padded tail rows cannot leak
        # into the partial sums.
        valid = y_ref[...] != -1
        loss = jnp.where(valid, m_sc[...] + jnp.log(s_sc[...]) - lab_ref[...], 0.0)
        psum_ref[0] = jnp.sum(loss, axis=0, keepdims=True)
        pcnt_ref[0] = jnp.sum(valid.astype(jnp.float32), axis=0, keepdims=True)


def _masked_cross_entropy_mean_pallas(logits, labels):
    """Mean CE over rows with label != -1 (== torch CrossEntropyLoss(ignore_index=-1))."""
    labels = jnp.asarray(labels, jnp.int32)
    N, C = logits.shape
    itemsize = jnp.dtype(logits.dtype).itemsize

    # dtype-dependent sublane multiple: 8 (f32) / 16 (bf16) / 32 (i8, fp8).
    sublane = max(8, 32 // max(itemsize, 1))

    # Class tile: minimise last-tile overshoot (V=30522 -> 8 x 3840 instead of 8 x 4096).
    n_ct = pl.cdiv(C, MAX_TILE_C)
    tile_c = min(_round_up(C, 128), _round_up(pl.cdiv(C, n_ct), 128))

    # Row tile: bigger blocks for narrower dtypes; capped so that the double-buffered
    # logits block + elementwise temporaries stay well inside v7x's 64 MiB VMEM.
    # (On v6e with 128 MiB VMEM a 512-row fp32 tile is also viable.)
    tile_n_cap = 512 if itemsize <= 2 else 256
    tile_n = min(tile_n_cap, _round_up(max(N, 1), sublane))

    g_rows = pl.cdiv(N, tile_n)
    g_cols = pl.cdiv(C, tile_c)

    # Only the tiny per-row side inputs are padded on the host; -1 labels also mask any
    # garbage tail rows of the (unpadded) logits' last partial block.
    n_pad = g_rows * tile_n
    pad = n_pad - N
    lab = jnp.take_along_axis(
        logits, jnp.clip(labels, 0, C - 1)[:, None], axis=1)[:, 0].astype(jnp.float32)
    lab = jnp.pad(lab, (0, pad)).reshape(n_pad, 1)
    y = jnp.pad(labels, (0, pad), constant_values=-1).reshape(n_pad, 1)

    kernel = functools.partial(_ce_kernel, num_classes=C)

    psum, pcnt = pl.pallas_call(
        kernel,
        out_shape=(
            jax.ShapeDtypeStruct((g_rows, 1, 1), jnp.float32),
            jax.ShapeDtypeStruct((g_rows, 1, 1), jnp.float32),
        ),
        grid_spec=pltpu.PrefetchScalarGridSpec(
            num_scalar_prefetch=0,
            grid=(g_rows, g_cols),
            in_specs=[
                pl.BlockSpec((tile_n, tile_c), lambda i, k: (i, k)),
                pl.BlockSpec((tile_n, 1), lambda i, k: (i, 0)),
                pl.BlockSpec((tile_n, 1), lambda i, k: (i, 0)),
            ],
            out_specs=[
                pl.BlockSpec((1, 1, 1), lambda i, k: (i, 0, 0)),
                pl.BlockSpec((1, 1, 1), lambda i, k: (i, 0, 0)),
            ],
            scratch_shapes=[
                pltpu.VMEM((tile_n, 1), jnp.float32),   # running max
                pltpu.VMEM((tile_n, 1), jnp.float32),   # running sum-exp
            ],
        ),
        compiler_params=pltpu.CompilerParams(
            dimension_semantics=("parallel", "arbitrary"),
            vmem_limit_bytes=48 * 1024 * 1024),
    )(logits, lab, y)

    # Matches PyTorch: 0/0 -> NaN if every label is ignored.
    return jnp.sum(psum) / jnp.sum(pcnt)


def _masked_cross_entropy_mean_jnp(logits, labels):
    """Plain-jnp masked CE mean for the tiny NSP head (B x 2)."""
    logits = jnp.asarray(logits, jnp.float32)
    labels = jnp.asarray(labels, jnp.int32)
    lse = jax.scipy.special.logsumexp(logits, axis=-1)
    lab = jnp.take_along_axis(
        logits, jnp.clip(labels, 0, logits.shape[-1] - 1)[:, None], axis=-1)[:, 0]
    valid = labels != -1
    return jnp.sum(jnp.where(valid, lse - lab, 0.0)) / jnp.sum(valid)


class BertPretrainingCriterion:
    """JAX/Pallas port of the PyTorch BertPretrainingCriterion module.

    Args:
      vocab_size: MLM vocabulary size.
      max_masked_rows: optional static upper bound on the number of labelled MLM
        positions per batch (batch_size * max_predictions_per_seq). When given,
        valid rows are compacted before the kernel so only ~15% of the logits are
        processed; semantics are identical as long as the bound holds.
    """

    def __init__(self, vocab_size, max_masked_rows=None):
        self.vocab_size = vocab_size
        self.max_masked_rows = max_masked_rows

    def __call__(self, prediction_scores, seq_relationship_score,
                 masked_lm_labels, next_sentence_labels):
        mlm_logits = prediction_scores.reshape(-1, self.vocab_size)
        mlm_labels = masked_lm_labels.reshape(-1).astype(jnp.int32)
        nsp_logits = seq_relationship_score.reshape(-1, 2)
        nsp_labels = next_sentence_labels.reshape(-1).astype(jnp.int32)

        if self.max_masked_rows is not None:
            # Valid-row compaction: gather only rows with label != -1 (padded to the
            # static bound with -1 labels), so the Pallas kernel streams ~6-7x fewer rows.
            n = mlm_labels.shape[0]
            m = min(int(self.max_masked_rows), n)
            valid = mlm_labels != -1
            (idx,) = jnp.nonzero(valid, size=m, fill_value=0)
            keep = jnp.arange(m) < jnp.sum(valid)
            mlm_logits = jnp.take(mlm_logits, idx, axis=0)
            mlm_labels = jnp.where(keep, mlm_labels[idx], -1)

        masked_lm_loss = _masked_cross_entropy_mean_pallas(mlm_logits, mlm_labels)
        # NSP head is a few KB: a second pallas_call would only add launch overhead.
        next_sentence_loss = _masked_cross_entropy_mean_jnp(nsp_logits, nsp_labels)
        return masked_lm_loss + next_sentence_loss


if __name__ == "__main__":
    # Small synthetic shapes consistent with BERT pretraining heads.
    # vocab deliberately NOT a multiple of 128 and rows NOT a multiple of the row tile,
    # to exercise both partial-block masking paths.
    batch, seq, vocab = 2, 8, 500

    key = jax.random.PRNGKey(0)
    k1, k2, k3, k4, k5 = jax.random.split(key, 5)

    prediction_scores = jax.random.normal(k1, (batch, seq, vocab), dtype=jnp.float32)
    seq_relationship_score = jax.random.normal(k2, (batch, 2), dtype=jnp.float32)

    # MLM labels: mostly -1 (ignored), a few real token ids; force >= 1 valid label.
    masked_lm_labels = jax.random.randint(k3, (batch, seq), 0, vocab, dtype=jnp.int32)
    mask_keep = jax.random.bernoulli(k4, p=0.25, shape=(batch, seq))
    masked_lm_labels = jnp.where(mask_keep, masked_lm_labels, -1)
    masked_lm_labels = masked_lm_labels.at[0, 0].set(7)

    next_sentence_labels = jax.random.randint(k5, (batch,), 0, 2, dtype=jnp.int32)

    # Pure-JAX reference (same semantics as torch CrossEntropyLoss(ignore_index=-1)).
    def ref_ce(logits, labels):
        logits = logits.astype(jnp.float32)
        lse = jax.scipy.special.logsumexp(logits, axis=-1)
        lab = jnp.take_along_axis(
            logits, jnp.clip(labels, 0, logits.shape[-1] - 1)[:, None], axis=-1)[:, 0]
        valid = labels != -1
        return jnp.sum(jnp.where(valid, lse - lab, 0.0)) / jnp.sum(valid)

    def ref_total(ps, srs, mll, nsl):
        return (ref_ce(ps.reshape(-1, ps.shape[-1]), mll.reshape(-1))
                + ref_ce(srs.reshape(-1, 2), nsl.reshape(-1)))

    # 1) Default full-stream path, fp32 logits.
    criterion = BertPretrainingCriterion(vocab)
    total_loss = jax.jit(criterion.__call__)(
        prediction_scores, seq_relationship_score,
        masked_lm_labels, next_sentence_labels)
    total_loss = jax.block_until_ready(total_loss)
    ref = ref_total(prediction_scores, seq_relationship_score,
                    masked_lm_labels, next_sentence_labels)
    assert jnp.allclose(total_loss, ref, rtol=1e-4, atol=1e-4), (total_loss, ref)

    # 2) bf16 logits path (dtype-dependent row tiling; no host-side up-cast copy).
    ps_bf16 = prediction_scores.astype(jnp.bfloat16)
    total_bf16 = jax.jit(criterion.__call__)(
        ps_bf16, seq_relationship_score, masked_lm_labels, next_sentence_labels)
    total_bf16 = jax.block_until_ready(total_bf16)
    ref_bf16 = ref_total(ps_bf16, seq_relationship_score,
                         masked_lm_labels, next_sentence_labels)
    assert jnp.allclose(total_bf16, ref_bf16, rtol=1e-4, atol=1e-4), (total_bf16, ref_bf16)

    # 3) Valid-row compaction path (static bound on labelled positions).
    criterion_c = BertPretrainingCriterion(vocab, max_masked_rows=batch * seq)
    total_c = jax.jit(criterion_c.__call__)(
        prediction_scores, seq_relationship_score,
        masked_lm_labels, next_sentence_labels)
    total_c = jax.block_until_ready(total_c)
    assert jnp.allclose(total_c, ref, rtol=1e-4, atol=1e-4), (total_c, ref)

    print("KERNEL_OK")
</pallas_src>

<mosaic_0001>
module attributes {stable_mosaic.version = 11 : i64} {
  func.func @_ce_kernel(%arg0: i32, %arg1: i32, %arg2: memref<16x512xf32, #tpu.memory_space<vmem>>, %arg3: memref<16x1xf32, #tpu.memory_space<vmem>>, %arg4: memref<16x1xi32, #tpu.memory_space<vmem>>, %arg5: memref<1x1x1xf32, #tpu.memory_space<vmem>>, %arg6: memref<1x1x1xf32, #tpu.memory_space<vmem>>, %arg7: memref<16x1xf32, #tpu.memory_space<vmem>>, %arg8: memref<16x1xf32, #tpu.memory_space<vmem>>) attributes {dimension_semantics = [#tpu.dimension_semantics<parallel>, #tpu.dimension_semantics<arbitrary>], iteration_bounds = array<i64: 1, 1>, scalar_prefetch = 0 : i64, scratch_operands = 2 : i64, tpu.core_type = #tpu.core_type<tc>, window_params = [{transform_indices = @transform_0, window_bounds = array<i64: 16, 512>}, {transform_indices = @transform_1, window_bounds = array<i64: 16, 1>}, {transform_indices = @transform_2, window_bounds = array<i64: 16, 1>}, {transform_indices = @transform_3, window_bounds = array<i64: 1, 1, 1>}, {transform_indices = @transform_4, window_bounds = array<i64: 1, 1, 1>}]} {
    %c0_i32 = arith.constant 0 : i32
    %0 = arith.cmpi eq, %arg1, %c0_i32 : i32
    %1 = arith.extui %0 : i1 to i32
    %c0_i32_0 = arith.constant 0 : i32
    %2 = arith.cmpi ne, %1, %c0_i32_0 : i32
    scf.if %2 {
      %cst = arith.constant -1.000000e+30 : f32
      %12 = vector.broadcast %cst : f32 to vector<16x1xf32>
      %c0 = arith.constant 0 : index
      %c0_7 = arith.constant 0 : index
      %13 = vector.load %arg7[%c0, %c0_7] : memref<16x1xf32, #tpu.memory_space<vmem>>, vector<16x1xf32>
      tpu.vector_store %arg7[%c0, %c0_7], %12 {strides = array<i32>} : memref<16x1xf32, #tpu.memory_space<vmem>>, vector<16x1xf32>,
      %cst_8 = arith.constant 0.000000e+00 : f32
      %14 = vector.broadcast %cst_8 : f32 to vector<16x1xf32>
      %c0_9 = arith.constant 0 : index
      %c0_10 = arith.constant 0 : index
      %15 = vector.load %arg8[%c0_9, %c0_10] : memref<16x1xf32, #tpu.memory_space<vmem>>, vector<16x1xf32>
      tpu.vector_store %arg8[%c0_9, %c0_10], %14 {strides = array<i32>} : memref<16x1xf32, #tpu.memory_space<vmem>>, vector<16x1xf32>,
    } else {
    }
    %c0_i32_1 = arith.constant 0 : i32
    %3 = arith.cmpi slt, %arg1, %c0_i32_1 : i32
    %4 = arith.extui %3 : i1 to i32
    %c0_i32_2 = arith.constant 0 : i32
    %5 = arith.cmpi ne, %4, %c0_i32_2 : i32
    scf.if %5 {
      %c0 = arith.constant 0 : index
      %c0_7 = arith.constant 0 : index
      %12 = vector.load %arg2[%c0, %c0_7] : memref<16x512xf32, #tpu.memory_space<vmem>>, vector<16x512xf32>
      %c0_8 = arith.constant 0 : index
      %c0_9 = arith.constant 0 : index
      %13 = vector.load %arg7[%c0_8, %c0_9] : memref<16x1xf32, #tpu.memory_space<vmem>>, vector<16x1xf32>
      %cst = arith.constant dense<0xFF800000> : vector<16xf32>
      %14 = vector.multi_reduction <maximumf>, %12, %cst [1] : vector<16x512xf32> to vector<16xf32>
      %15 = vector.shape_cast %14 : vector<16xf32> to vector<16x1xf32>
      %16 = arith.maximumf %13, %15 : vector<16x1xf32>
      %c0_10 = arith.constant 0 : index
      %c0_11 = arith.constant 0 : index
      %17 = vector.load %arg8[%c0_10, %c0_11] : memref<16x1xf32, #tpu.memory_space<vmem>>, vector<16x1xf32>
      %18 = arith.subf %13, %16 : vector<16x1xf32>
      %19 = math.exp %18 : vector<16x1xf32>
      %20 = arith.mulf %17, %19 : vector<16x1xf32>
      %21 = vector.broadcast %16 : vector<16x1xf32> to vector<16x512xf32>
      %22 = arith.subf %12, %21 : vector<16x512xf32>
      %23 = math.exp %22 : vector<16x512xf32>
      %cst_12 = arith.constant dense<0.000000e+00> : vector<16xf32>
      %24 = vector.multi_reduction <add>, %23, %cst_12 [1] : vector<16x512xf32> to vector<16xf32>
      %25 = vector.shape_cast %24 : vector<16xf32> to vector<16x1xf32>
      %26 = arith.addf %20, %25 : vector<16x1xf32>
      %c0_13 = arith.constant 0 : index
      %c0_14 = arith.constant 0 : index
      %27 = vector.load %arg8[%c0_13, %c0_14] : memref<16x1xf32, #tpu.memory_space<vmem>>, vector<16x1xf32>
      tpu.vector_store %arg8[%c0_13, %c0_14], %26 {strides = array<i32>} : memref<16x1xf32, #tpu.memory_space<vmem>>, vector<16x1xf32>,
      %c0_15 = arith.constant 0 : index
      %c0_16 = arith.constant 0 : index
      %28 = vector.load %arg7[%c0_15, %c0_16] : memref<16x1xf32, #tpu.memory_space<vmem>>, vector<16x1xf32>
      tpu.vector_store %arg7[%c0_15, %c0_16], %16 {strides = array<i32>} : memref<16x1xf32, #tpu.memory_space<vmem>>, vector<16x1xf32>,
    } else {
    }
    %c0_i32_3 = arith.constant 0 : i32
    %6 = arith.cmpi eq, %arg1, %c0_i32_3 : i32
    %7 = arith.extui %6 : i1 to i32
    %c0_i32_4 = arith.constant 0 : i32
    %8 = arith.cmpi ne, %7, %c0_i32_4 : i32
    scf.if %8 {
      %c0 = arith.constant 0 : index
      %c0_7 = arith.constant 0 : index
      %12 = vector.load %arg2[%c0, %c0_7] : memref<16x512xf32, #tpu.memory_space<vmem>>, vector<16x512xf32>
      %13 = tpu.iota {dimensions = array<i32: 1>} : vector<16x512xi32>
      %c500_i32 = arith.constant 500 : i32
      %14 = vector.broadcast %c500_i32 : i32 to vector<16x512xi32>
      %15 = arith.cmpi slt, %13, %14 : vector<16x512xi32>
      %cst = arith.constant -1.000000e+30 : f32
      %16 = vector.broadcast %cst : f32 to vector<16x512xf32>
      %17 = arith.select %15, %12, %16 : vector<16x512xi1>, vector<16x512xf32>
      %c0_8 = arith.constant 0 : index
      %c0_9 = arith.constant 0 : index
      %18 = vector.load %arg7[%c0_8, %c0_9] : memref<16x1xf32, #tpu.memory_space<vmem>>, vector<16x1xf32>
      %cst_10 = arith.constant dense<0xFF800000> : vector<16xf32>
      %19 = vector.multi_reduction <maximumf>, %17, %cst_10 [1] : vector<16x512xf32> to vector<16xf32>
      %20 = vector.shape_cast %19 : vector<16xf32> to vector<16x1xf32>
      %21 = arith.maximumf %18, %20 : vector<16x1xf32>
      %c0_11 = arith.constant 0 : index
      %c0_12 = arith.constant 0 : index
      %22 = vector.load %arg8[%c0_11, %c0_12] : memref<16x1xf32, #tpu.memory_space<vmem>>, vector<16x1xf32>
      %23 = arith.subf %18, %21 : vector<16x1xf32>
      %24 = math.exp %23 : vector<16x1xf32>
      %25 = arith.mulf %22, %24 : vector<16x1xf32>
      %26 = vector.broadcast %21 : vector<16x1xf32> to vector<16x512xf32>
      %27 = arith.subf %17, %26 : vector<16x512xf32>
      %28 = math.exp %27 : vector<16x512xf32>
      %cst_13 = arith.constant dense<0.000000e+00> : vector<16xf32>
      %29 = vector.multi_reduction <add>, %28, %cst_13 [1] : vector<16x512xf32> to vector<16xf32>
      %30 = vector.shape_cast %29 : vector<16xf32> to vector<16x1xf32>
      %31 = arith.addf %25, %30 : vector<16x1xf32>
      %c0_14 = arith.constant 0 : index
      %c0_15 = arith.constant 0 : index
      %32 = vector.load %arg8[%c0_14, %c0_15] : memref<16x1xf32, #tpu.memory_space<vmem>>, vector<16x1xf32>
      tpu.vector_store %arg8[%c0_14, %c0_15], %31 {strides = array<i32>} : memref<16x1xf32, #tpu.memory_space<vmem>>, vector<16x1xf32>,
      %c0_16 = arith.constant 0 : index
      %c0_17 = arith.constant 0 : index
      %33 = vector.load %arg7[%c0_16, %c0_17] : memref<16x1xf32, #tpu.memory_space<vmem>>, vector<16x1xf32>
      tpu.vector_store %arg7[%c0_16, %c0_17], %21 {strides = array<i32>} : memref<16x1xf32, #tpu.memory_space<vmem>>, vector<16x1xf32>,
    } else {
    }
    %c0_i32_5 = arith.constant 0 : i32
    %9 = arith.cmpi eq, %arg1, %c0_i32_5 : i32
    %10 = arith.extui %9 : i1 to i32
    %c0_i32_6 = arith.constant 0 : i32
    %11 = arith.cmpi ne, %10, %c0_i32_6 : i32
    scf.if %11 {
      %c0 = arith.constant 0 : index
      %c0_7 = arith.constant 0 : index
      %12 = vector.load %arg4[%c0, %c0_7] : memref<16x1xi32, #tpu.memory_space<vmem>>, vector<16x1xi32>
      %c-1_i32 = arith.constant -1 : i32
      %13 = vector.broadcast %c-1_i32 : i32 to vector<16x1xi32>
      %14 = arith.cmpi ne, %12, %13 : vector<16x1xi32>
      %c0_8 = arith.constant 0 : index
      %c0_9 = arith.constant 0 : index
      %15 = vector.load %arg7[%c0_8, %c0_9] : memref<16x1xf32, #tpu.memory_space<vmem>>, vector<16x1xf32>
      %c0_10 = arith.constant 0 : index
      %c0_11 = arith.constant 0 : index
      %16 = vector.load %arg8[%c0_10, %c0_11] : memref<16x1xf32, #tpu.memory_space<vmem>>, vector<16x1xf32>
      %17 = math.log %16 : vector<16x1xf32>
      %18 = arith.addf %15, %17 : vector<16x1xf32>
      %c0_12 = arith.constant 0 : index
      %c0_13 = arith.constant 0 : index
      %19 = vector.load %arg3[%c0_12, %c0_13] : memref<16x1xf32, #tpu.memory_space<vmem>>, vector<16x1xf32>
      %20 = arith.subf %18, %19 : vector<16x1xf32>
      %cst = arith.constant 0.000000e+00 : f32
      %21 = vector.broadcast %cst : f32 to vector<16x1xf32>
      %22 = arith.select %14, %20, %21 : vector<16x1xi1>, vector<16x1xf32>
      %cst_14 = arith.constant dense<0.000000e+00> : vector<1xf32>
      %23 = vector.multi_reduction <add>, %22, %cst_14 [0] : vector<16x1xf32> to vector<1xf32>
      %24 = vector.shape_cast %23 : vector<1xf32> to vector<1x1xf32>
      %c0_15 = arith.constant 0 : index
      %c0_16 = arith.constant 0 : index
      %c0_17 = arith.constant 0 : index
      %25 = vector.load %arg5[%c0_15, %c0_16, %c0_17] : memref<1x1x1xf32, #tpu.memory_space<vmem>>, vector<1x1x1xf32>
      %26 = vector.shape_cast %25 : vector<1x1x1xf32> to vector<1x1xf32>
      %27 = vector.shape_cast %24 : vector<1x1xf32> to vector<1x1x1xf32>
      tpu.vector_store %arg5[%c0_15, %c0_16, %c0_17], %27 {strides = array<i32>} : memref<1x1x1xf32, #tpu.memory_space<vmem>>, vector<1x1x1xf32>,
      %28 = arith.extui %14 : vector<16x1xi1> to vector<16x1xi32>
      %29 = arith.sitofp %28 : vector<16x1xi32> to vector<16x1xf32>
      %cst_18 = arith.constant dense<0.000000e+00> : vector<1xf32>
      %30 = vector.multi_reduction <add>, %29, %cst_18 [0] : vector<16x1xf32> to vector<1xf32>
      %31 = vector.shape_cast %30 : vector<1xf32> to vector<1x1xf32>
      %c0_19 = arith.constant 0 : index
      %c0_20 = arith.constant 0 : index
      %c0_21 = arith.constant 0 : index
      %32 = vector.load %arg6[%c0_19, %c0_20, %c0_21] : memref<1x1x1xf32, #tpu.memory_space<vmem>>, vector<1x1x1xf32>
      %33 = vector.shape_cast %32 : vector<1x1x1xf32> to vector<1x1xf32>
      %34 = vector.shape_cast %31 : vector<1x1xf32> to vector<1x1x1xf32>
      tpu.vector_store %arg6[%c0_19, %c0_20, %c0_21], %34 {strides = array<i32>} : memref<1x1x1xf32, #tpu.memory_space<vmem>>, vector<1x1x1xf32>,
    } else {
    }
    return
  }
  func.func @transform_0(%arg0: i32, %arg1: i32) -> (i32, i32) {
    %c0_i32 = arith.constant 0 : i32
    return %arg0, %arg1 : i32, i32
  }
  func.func @transform_1(%arg0: i32, %arg1: i32) -> (i32, i32) {
    %c0_i32 = arith.constant 0 : i32
    %c0_i32_0 = arith.constant 0 : i32
    return %arg0, %c0_i32 : i32, i32
  }
  func.func @transform_2(%arg0: i32, %arg1: i32) -> (i32, i32) {
    %c0_i32 = arith.constant 0 : i32
    %c0_i32_0 = arith.constant 0 : i32
    return %arg0, %c0_i32 : i32, i32
  }
  func.func @transform_3(%arg0: i32, %arg1: i32) -> (i32, i32, i32) {
    %c0_i32 = arith.constant 0 : i32
    %c0_i32_0 = arith.constant 0 : i32
    %c0_i32_1 = arith.constant 0 : i32
    return %arg0, %c0_i32, %c0_i32_0 : i32, i32, i32
  }
  func.func @transform_4(%arg0: i32, %arg1: i32) -> (i32, i32, i32) {
    %c0_i32 = arith.constant 0 : i32
    %c0_i32_0 = arith.constant 0 : i32
    %c0_i32_1 = arith.constant 0 : i32
    return %arg0, %c0_i32, %c0_i32_0 : i32, i32, i32
  }
}

</mosaic_0001>

<bundles_post_ra>
// kernel: a_call__.1
= control target key start
LH: loop header
LB: loop body
LE: loop exit
PB: predicated region body
PF: predicated region fallthrough
CT: control target
= control target key end

     0   :  { %10 = vsyncpa [#allocation5], 0  ;;  %v125_v0 = vlaneseq  ;;  %s513_s0 = inlined_call_operand.vmem [shape: f32[16,500], index: 0, kind: input, shape index: {}]   ;;  %s514_s1 = inlined_call_operand.vmem [shape: f32[16,1], index: 1, kind: input, shape index: {}]   ;;  %s515_s2 = inlined_call_operand.vmem [shape: s32[16,1], index: 2, kind: input, shape index: {}]   ;;  %s516_s3 = inlined_call_operand.hbm [shape: f32[1,1,1], index: 3, kind: output, shape index: {0}]   ;;  %s517_s4 = inlined_call_operand.hbm [shape: f32[1,1,1], index: 4, kind: output, shape index: {1}]  }
   0x2   :  { %v126_v1 = vand.u32 127, %v125_v0 }
   0x3   :  { %11 = vsyncpa [#allocation7], 0  ;;  %v117_v2 = vld [vmem:[%s513_s0] sm:$0xff]  ;;  %v119_v3 = vld [vmem:[%s513_s0 + $0x10] sm:$0xff]  ;;  %vm22_vm1 = vcmask 7168   ;;  %v372_v20 = vmov 0  }
   0x4   :  { %v118_v4 = vld [vmem:[%s513_s0 + $0x8] sm:$0xff]  ;;  %v120_v5 = vld [vmem:[%s513_s0 + $0x18] sm:$0xff]  ;;  %v129_v6 = vadd.s32 384, %v126_v1  ;;  %v121_v8 = vld [vmem:[%s513_s0 + $0x20] sm:$0xff]  ;;  %v144_v11 = vmax.f32 %v117_v2, %v119_v3  ;;  %v371_v19 = vmov -1e+30   ;;  %297 = vset.pattern.permute.xlu1 %v372_v20  ;;  %298 = vset.pattern.permute.xlu0 %v372_v20 }
   0x5   :  { %v124_v7 = vld [vmem:[%s513_s0 + $0x38] sm:$0xff]  ;;  %v122_v9 = vld [vmem:[%s513_s0 + $0x28] sm:$0xff]  ;;  %v123_v10 = vld [vmem:[%s513_s0 + $0x30] sm:$0xff]  ;;  %23 = vst.msk [vmem:[#allocation2] sm:$0xff] %vm22_vm1, %v371_v19  ;;  %v373_v21 = vmov 0.0   ;;  %vm246_vm4 = vcmask 0  }
   0x6   :  { %vm133_vm0 = vcmp.lt.s32.totalorder %v129_v6, 500  ;;  %v149_v15 = vmax.f32 %v121_v8, %v123_v10  ;;  %24 = vst.msk [vmem:[#allocation2 + $0x8] sm:$0xff] %vm22_vm1, %v371_v19  ;;  %25 = vst.msk [vmem:[#allocation3] sm:$0xff] %vm22_vm1, %v373_v21  ;;  %v452_v62 = vld [vmem:[%s515_s2 + $0x8] sm:$0xff]  ;;  %v457_v63 = vld [vmem:[%s515_s2] sm:$0xff]  ;;  %s374_s2 = smov [#allocation6]  }
   0x7   :  { %v137_v12 = vsel %vm133_vm0, %v120_v5, -1e+30  ;;  %v141_v13 = vsel %vm133_vm0, %v124_v7, -1e+30  ;;  %26 = vst.msk [vmem:[#allocation3 + $0x8] sm:$0xff] %vm22_vm1, %v373_v21  ;;  %vm220_vm2 = vcmp.ne.s32.totalorder %v452_v62, 4294967295 }
   0x8   :  { %v145_v14 = vmax.f32 %v118_v4, %v137_v12  ;;  %v150_v16 = vmax.f32 %v122_v9, %v141_v13  ;;  %vm219_vm3 = vcmp.ne.s32.totalorder %v457_v63, 4294967295  ;;  %v291_v1 = vsel %vm220_vm2, 1.0, %v373_v21  ;;  %s278_s8 = sshll.u32 %s374_s2, 4  ;;  %s279_s8 = int_to_ptr.vmem [resolvable:$true] %s278_s8 }
   0x9   :  { %v290_v0 = vsel %vm219_vm3, 1.0, %v373_v21  ;;  %s323_s9 = scalar_lea.vmem %s279_s8, 16  ;;  %s327_s10 = scalar_lea.vmem %s279_s8, 32 }
   0xa   :  { %v146_v17 = vmax.f32 %v144_v11, %v145_v14  ;;  %v151_v18 = vmax.f32 %v149_v15, %v150_v16  ;;  %p324_p0 = scmp.ne.s32.totalorder %s279_s8, %s323_s9  ;;  %p328_p1 = scmp.lt.s32.totalorder %s279_s8, %s279_s8 }
   0xb   :  { %p329_p2 = scmp.lt.s32.totalorder %s327_s10, %s323_s9 }
   0xc   :  { %147 = vmax.xlane.f32.xlu0 %v146_v17  ;;  %v429_v22 = vld [vmem:[#allocation2] sm:$0xff] }
   0xd   :  { %v434_v25 = vld [vmem:[#allocation2 + $0x8] sm:$0xff]  ;;  %p330_p3 = por %p329_p2, %p328_p1 }
   0xf   :  { %p331_p4 = pnand %p330_p3, %p324_p0 }
  0x10   :  { %152 = vmax.xlane.f32.xlu0 %v151_v18 }
  0x99   :  { %v148_v23 = vpop.xlane.xlu0 %147 }
  0x9a   :  { %v432_v24 = vmax.f32 %v429_v22, %v148_v23 }
  0x9c   :  { %v158_v26 = vsub.f32 %v429_v22, %v432_v24  ;;  %215 = vst.msk [vmem:[#allocation2] sm:$0xff] %vm22_vm1, %v432_v24  ;;  %168 = vperm.xlu1 %297, %v432_v24  }
  0x9d   :  { %v153_v27 = vpop.xlane.xlu0 %152 }
  0x9e   :  { %v442_v28 = vmax.f32 %v434_v25, %v153_v27 }
  0xa0   :  { %v159_v29 = vsub.f32 %v434_v25, %v442_v28  ;;  %216 = vst.msk [vmem:[#allocation2 + $0x8] sm:$0xff] %vm22_vm1, %v442_v28  ;;  %173 = vperm.xlu1 %297, %v442_v28  }
 0x11b   :  { %v169_v30 = vpop.permute.xlu1 %168 }
 0x11c   :  { %v176_v31 = vsub.f32 %v117_v2, %v169_v30  ;;  %v177_v32 = vsub.f32 %v118_v4, %v169_v30  ;;  %v178_v33 = vsub.f32 %v119_v3, %v169_v30  ;;  %v179_v34 = vsub.f32 %v137_v12, %v169_v30 }
 0x11d   :  { %v252_v2 = vsel %vm22_vm1, %v290_v0, 0.0  ;;  %v253_v3 = vsel %vm22_vm1, %v291_v1, 0.0 }
 0x11e   :  { %v184_v35 = vmul.f32 1.442695, %v176_v31  ;;  %v186_v36 = vmul.f32 1.442695, %v177_v32  ;;  %v188_v37 = vmul.f32 1.442695, %v178_v33  ;;  %v254_v4 = vadd.f32 %v253_v3, %v252_v2 }
 0x11f   :  { %v190_v38 = vmul.f32 1.442695, %v179_v34  ;;  %v174_v39 = vpop.permute.xlu1 %173 }
 0x120   :  { %299 = vpow2.f32 %v184_v35  ;;  %v180_v40 = vsub.f32 %v121_v8, %v174_v39  ;;  %v181_v41 = vsub.f32 %v122_v9, %v174_v39  ;;  %v182_v42 = vsub.f32 %v123_v10, %v174_v39 }
 0x121   :  { %301 = vpow2.f32 %v186_v36  ;;  %v183_v43 = vsub.f32 %v141_v13, %v174_v39  ;;  %v255_v5 = vrot.slane %v254_v4, 4 }
 0x122   :  { %303 = vpow2.f32 %v188_v37  ;;  %v192_v44 = vmul.f32 1.442695, %v180_v40  ;;  %v194_v45 = vmul.f32 1.442695, %v181_v41  ;;  %v196_v46 = vmul.f32 1.442695, %v182_v42 }
 0x123   :  { %305 = vpow2.f32 %v190_v38  ;;  %v198_v47 = vmul.f32 1.442695, %v183_v43  ;;  %v256_v6 = vadd.f32 %v255_v5, %v254_v4 }
 0x124   :  { %307 = vpow2.f32 %v192_v44 }
 0x125   :  { %309 = vpow2.f32 %v194_v45  ;;  %v257_v7 = vrot.slane %v256_v6, 2 }
 0x126   :  { %311 = vpow2.f32 %v196_v46 }
 0x127   :  { %313 = vpow2.f32 %v198_v47  ;;  %v258_v8 = vadd.f32 %v257_v7, %v256_v6 }
 0x129   :  { %v259_v9 = vrot.slane %v258_v8, 1 }
 0x12a   :  { %v300_v48 = vpop.eup %299 }
 0x12b   :  { %v302_v49 = vpop.eup %301  ;;  %v260_v10 = vadd.f32 %v259_v9, %v258_v8 }
 0x12c   :  { %v304_v50 = vpop.eup %303  ;;  %v200_v51 = vadd.f32 %v302_v49, %v300_v48 }
 0x12d   :  { %v306_v52 = vpop.eup %305  ;;  %261 = vst.msk [vmem:[#allocation6] sm:$0x1] %vm246_vm4, %v260_v10 }
 0x12e   :  { %v308_v53 = vpop.eup %307  ;;  %v201_v54 = vadd.f32 %v304_v50, %v200_v51 }
 0x12f   :  { %v310_v55 = vpop.eup %309 }
 0x130   :  { %v202_v56 = vadd.f32 %v306_v52, %v201_v54  ;;  %v205_v57 = vadd.f32 %v310_v55, %v308_v53  ;;  %v312_v58 = vpop.eup %311 }
 0x131   :  { %v314_v60 = vpop.eup %313 }
 0x132   :  { %203 = vadd.xlane.f32.xlu0 %v202_v56  ;;  %v206_v59 = vadd.f32 %v312_v58, %v205_v57 }
 0x134   :  { %v207_v61 = vadd.f32 %v314_v60, %v206_v59 }
 0x136   :  { %208 = vadd.xlane.f32.xlu1 %v207_v61 }
 0x137   :  { %334 = shalt.err (!%p331_p4)
}
 0x138   :  { %s335_s13 = scalar_lea.hbm %s517_s4, 16 }
 0x139   :  { %p336_p5 = scmp.ne.s32.totalorder %s517_s4, %s335_s13  ;;  %p339_p6 = scmp.lt.u32.totalorder %s335_s13, %s517_s4 }
 0x13b   :  { %p341_p7 = pnand %p339_p6, %p336_p5 }
 0x13d   :  { %344 = shalt.err (!%p341_p7)
}
 0x13e   :  { %281 = dma.vmem_to_hbm [thread:$0]  %s279_s8, 16, %s517_s4, [#allocation7]   ;;  %v160_v11 = vmul.f32 1.442695, %v158_v26  ;;  %v162_v12 = vmul.f32 1.442695, %v159_v29 }
 0x13f   :  { %v156_v14 = vld [vmem:[#allocation3] sm:$0xff]  ;;  %v157_v18 = vld [vmem:[#allocation3 + $0x8] sm:$0xff]  ;;  %v221_v27 = vld [vmem:[#allocation2] sm:$0xff]  ;;  %s375_s23 = smov [#allocation4]  }
 0x140   :  { %315 = vpow2.f32 %v160_v11  ;;  %v231_v28 = vld [vmem:[%s514_s1] sm:$0xff]  ;;  %v222_v33 = vld [vmem:[#allocation2 + $0x8] sm:$0xff]  ;;  %s268_s24 = sshll.u32 %s375_s23, 4  ;;  %s269_s24 = int_to_ptr.vmem [resolvable:$true] %s268_s24 }
 0x141   :  { %317 = vpow2.f32 %v162_v12  ;;  %v232_v34 = vld [vmem:[%s514_s1 + $0x8] sm:$0xff]  ;;  %s345_s1 = scalar_lea.vmem %s269_s24, 16  ;;  %s349_s25 = scalar_lea.vmem %s269_s24, 32 }
 0x142   :  { %p346_p8 = scmp.ne.s32.totalorder %s269_s24, %s345_s1  ;;  %p350_p9 = scmp.lt.s32.totalorder %s269_s24, %s269_s24 }
 0x143   :  { %p351_p10 = scmp.lt.s32.totalorder %s349_s25, %s345_s1 }
 0x145   :  { %p352_p11 = por %p351_p10, %p350_p9 }
 0x147   :  { %p353_p12 = pnand %p352_p11, %p346_p8 }
 0x14a   :  { %v316_v13 = vpop.eup %315 }
 0x14b   :  { %v164_v15 = vmul.f32 %v316_v13, %v156_v14  ;;  %v318_v16 = vpop.eup %317 }
 0x14c   :  { %v165_v20 = vmul.f32 %v318_v16, %v157_v18 }
 0x1bf   :  { %v204_v17 = vpop.xlane.xlu0 %203 }
 0x1c0   :  { %v210_v19 = vadd.f32 %v204_v17, %v164_v15 }
 0x1c2   :  { %213 = vst.msk [vmem:[#allocation3] sm:$0xff] %vm22_vm1, %v210_v19 }
 0x1c3   :  { %v209_v21 = vpop.xlane.xlu1 %208 }
 0x1c4   :  { %v211_v23 = vadd.f32 %v209_v21, %v165_v20 }
 0x1c6   :  { %214 = vst.msk [vmem:[#allocation3 + $0x8] sm:$0xff] %vm22_vm1, %v211_v23 }
 0x1c9   :  { %v223_v22 = vld [vmem:[#allocation3] sm:$0xff] }
 0x1ca   :  { %319 = vlog2.f32 %v223_v22 }
 0x1cd   :  { %v224_v24 = vld [vmem:[#allocation3 + $0x8] sm:$0xff] }
 0x1ce   :  { %321 = vlog2.f32 %v224_v24 }
 0x1d4   :  { %v320_v25 = vpop.eup %319 }
 0x1d5   :  { %v226_v26 = vmul.f32 0.6931472, %v320_v25 }
 0x1d7   :  { %v229_v29 = vadd.f32 %v226_v26, %v221_v27 }
 0x1d8   :  { %v322_v30 = vpop.eup %321 }
 0x1d9   :  { %v228_v31 = vmul.f32 0.6931472, %v322_v30  ;;  %v233_v32 = vsub.f32 %v229_v29, %v231_v28 }
 0x1db   :  { %v230_v35 = vadd.f32 %v228_v31, %v222_v33  ;;  %v235_v37 = vsel %vm219_vm3, %v233_v32, 0.0 }
 0x1dc   :  { %v237_v39 = vsel %vm22_vm1, %v235_v37, 0.0 }
 0x1dd   :  { %v234_v36 = vsub.f32 %v230_v35, %v232_v34 }
 0x1df   :  { %v236_v38 = vsel %vm220_vm2, %v234_v36, 0.0 }
 0x1e0   :  { %v238_v40 = vsel %vm22_vm1, %v236_v38, 0.0 }
 0x1e1   :  { %v239_v41 = vadd.f32 %v238_v40, %v237_v39 }
 0x1e3   :  { %v240_v42 = vrot.slane %v239_v41, 4 }
 0x1e5   :  { %v241_v43 = vadd.f32 %v240_v42, %v239_v41 }
 0x1e7   :  { %v242_v44 = vrot.slane %v241_v43, 2 }
 0x1e9   :  { %v243_v45 = vadd.f32 %v242_v44, %v241_v43 }
 0x1eb   :  { %v244_v46 = vrot.slane %v243_v45, 1 }
 0x1ed   :  { %v245_v47 = vadd.f32 %v244_v46, %v243_v45 }
 0x1ef   :  { %247 = vst.msk [vmem:[#allocation4] sm:$0x1] %vm246_vm4, %v245_v47 }
 0x1f0   :  { %356 = shalt.err (!%p353_p12)
}
 0x1f1   :  { %s357_s28 = scalar_lea.hbm %s516_s3, 16 }
 0x1f2   :  { %p358_p13 = scmp.ne.s32.totalorder %s516_s3, %s357_s28  ;;  %p361_p0 = scmp.lt.u32.totalorder %s357_s28, %s516_s3 }
 0x1f4   :  { %p363_p1 = pnand %p361_p0, %p358_p13 }
 0x1f6   :  { %366 = shalt.err (!%p363_p1)
}
 0x1f7   :  { %271 = dma.vmem_to_hbm [thread:$0]  %s269_s24, 16, %s516_s3, [#allocation5]  }
 0x1f8   :  { %367 = dma.done.wait [#allocation5], 16  }
 0x1f9   :  { %368 = vsyncadd [#allocation5], 4294967280 }
 0x1fa   :  { %369 = dma.done.wait [#allocation7], 16  }
 0x1fb   :  { %370 = vsyncadd [#allocation7], 4294967280 }
 0x1fc   :  { %288 = vsyncpa [#allocation5], 1 }
 0x1fd   :  { %289 = vsyncpa [#allocation7], 1 }

</bundles_post_ra>
